<compile_context>
chip_gen: v7x
topology: tpu7x:2x2x1
jax: 0.10.0
libtpu: 0.0.40
codegen_flags: <defaults>
</compile_context>

<pallas_src>
import math

import jax
import jax.numpy as jnp
from jax.experimental import pallas as pl
from jax.experimental.pallas import tpu as pltpu


_VMEM_BUDGET = 32 * 1024 * 1024   # conservative: fits v5e scoped & v7x physical VMEM


def _round_up(x, m):
    return (x + m - 1) // m * m


def _choose_row_tile(n, h_dim, itemsize, w_resident_bytes):
    """Largest row tile whose pipelined working set fits the VMEM budget."""
    def fits(rt):
        hc_bytes = 2 * 2 * rt * h_dim * itemsize      # h & c tiles, double-buffered
        out_bytes = 2 * rt * itemsize                 # (1, rt) output, double-buffered
        return w_resident_bytes + hc_bytes + out_bytes + (2 << 20) <= _VMEM_BUDGET

    if n <= 1024:                                     # whole problem in one grid step
        rt = _round_up(max(n, 8), 8)
        if fits(rt):
            return rt
    for rt in (1024, 512, 256, 128):                  # multiples of 128 -> lane-dense out
        if fits(rt):
            return rt
    # TODO(synk): for very large h_dim (>~2048 in f32) add a second, "arbitrary" grid
    # axis over W columns with a partial-sum accumulator instead of keeping all of W
    # resident (needed to stay inside v7x's 64 MiB VMEM).
    return 128


def _bilinear_kernel(b_ref, h_ref, c_ref, w_ref, o_ref):
    # t[n, j] = sum_i h[n, i] * W[i, j]   -- MXU matmul, f32 accumulation.
    t = jnp.dot(h_ref[...], w_ref[...], preferred_element_type=jnp.float32)
    # s[n] = sum_j t[n, j] * c[n, j]      -- VPU multiply + lane reduction.
    s = jnp.sum(t * c_ref[...].astype(jnp.float32), axis=-1)
    # Lane-dense store: one (1, row_tile) row per grid step (relayout rides the XLU).
    o_ref[...] = (s + b_ref[0]).reshape(1, -1).astype(o_ref.dtype)


def mvgrl_node_discriminator(h, c, weight, bias):
    """h, c: (N, h_dim); weight: (h_dim, h_dim); bias: scalar -> (N, 1)."""
    N, h_dim = h.shape
    assert c.shape == (N, h_dim)
    assert weight.shape == (h_dim, h_dim)

    itemsize = jnp.dtype(h.dtype).itemsize
    w_bytes = h_dim * h_dim * jnp.dtype(weight.dtype).itemsize

    # W's index_map is constant across the grid, so a second buffer is pure waste;
    # single-buffer it once that waste is big enough to matter for tile sizing.
    single_buffer_w = w_bytes >= (8 << 20)
    w_bufs = 1 if single_buffer_w else 2

    row_tile = _choose_row_tile(N, h_dim, itemsize, w_bufs * w_bytes)
    n_pad = _round_up(N, row_tile)
    if n_pad != N:                                    # masked tail via zero padding
        h = jnp.pad(h, ((0, n_pad - N), (0, 0)))
        c = jnp.pad(c, ((0, n_pad - N), (0, 0)))

    bias_arr = jnp.asarray(bias, jnp.float32).reshape(1)   # -> SMEM via scalar prefetch

    w_spec_kwargs = {}
    if single_buffer_w:
        w_spec_kwargs["pipeline_mode"] = pl.Buffered(1)
    w_spec = pl.BlockSpec((h_dim, h_dim), lambda i, b: (0, 0), **w_spec_kwargs)

    vmem_need = (2 * 2 * row_tile * h_dim * itemsize
                 + w_bufs * w_bytes
                 + 2 * row_tile * itemsize)
    vmem_limit = int(min(max(vmem_need + (8 << 20), 32 << 20), 64 << 20))

    cost = pl.CostEstimate(
        flops=2 * n_pad * h_dim * (h_dim + 1),
        transcendentals=0,
        bytes_accessed=(2 * n_pad * h_dim + h_dim * h_dim + n_pad) * itemsize,
    )

    grid = (n_pad // row_tile,)
    out = pl.pallas_call(
        _bilinear_kernel,
        out_shape=jax.ShapeDtypeStruct((1, n_pad), h.dtype),
        grid_spec=pltpu.PrefetchScalarGridSpec(
            num_scalar_prefetch=1,                    # bias lives in SMEM
            grid=grid,
            in_specs=[
                pl.BlockSpec((row_tile, h_dim), lambda i, b: (i, 0)),   # h tile
                pl.BlockSpec((row_tile, h_dim), lambda i, b: (i, 0)),   # c tile
                w_spec,                                                  # full W, resident
            ],
            out_specs=pl.BlockSpec((1, row_tile), lambda i, b: (0, i)),  # lane-dense
        ),
        compiler_params=pltpu.CompilerParams(
            dimension_semantics=("parallel",),
            vmem_limit_bytes=vmem_limit,
        ),
        cost_estimate=cost,
    )(bias_arr, h, c, weight)

    # (1, N_pad) lane-dense slab -> (N, 1) column expected by the module.
    return out.reshape(n_pad, 1)[:N]


if __name__ == "__main__":
    key = jax.random.PRNGKey(0)
    N, h_dim = 16, 32

    k_h, k_c, k_w, k_b = jax.random.split(key, 4)
    h = jax.random.normal(k_h, (N, h_dim), jnp.float32)
    c = jax.random.normal(k_c, (N, h_dim), jnp.float32)

    # Deterministic "parameters" matching nn.Bilinear(h_dim, h_dim, 1) init:
    # uniform(-1/sqrt(h_dim), 1/sqrt(h_dim)) for weight (1, h, h) and bias (1,).
    bound = 1.0 / math.sqrt(h_dim)
    weight = jax.random.uniform(k_w, (h_dim, h_dim), jnp.float32, -bound, bound)
    bias = jax.random.uniform(k_b, (), jnp.float32, -bound, bound)

    out = jax.block_until_ready(mvgrl_node_discriminator(h, c, weight, bias))

    # Pure-JAX reference check of the bilinear form.
    ref = jnp.einsum("ni,ij,nj->n", h, weight, c)[:, None] + bias
    assert out.shape == (N, 1)
    assert jnp.allclose(out, ref, atol=1e-4, rtol=1e-4)

    print("KERNEL_OK")
</pallas_src>

<mosaic_0001>
module attributes {stable_mosaic.version = 11 : i64} {
  func.func @_bilinear_kernel(%arg0: i32, %arg1: memref<1xf32, #tpu.memory_space<smem>>, %arg2: memref<16x32xf32, #tpu.memory_space<vmem>>, %arg3: memref<16x32xf32, #tpu.memory_space<vmem>>, %arg4: memref<32x32xf32, #tpu.memory_space<vmem>>, %arg5: memref<1x16xf32, #tpu.memory_space<vmem>>) attributes {dimension_semantics = [#tpu.dimension_semantics<parallel>], iteration_bounds = array<i64: 1>, scalar_prefetch = 1 : i64, scratch_operands = 0 : i64, tpu.core_type = #tpu.core_type<tc>, window_params = [{transform_indices = @transform_0, window_bounds = array<i64: 16, 32>}, {transform_indices = @transform_1, window_bounds = array<i64: 16, 32>}, {pipeline_mode = #tpu.pipeline_mode<synchronous>, transform_indices = @transform_2, window_bounds = array<i64: 32, 32>}, {transform_indices = @transform_3, window_bounds = array<i64: 1, 16>}]} {
    %c0 = arith.constant 0 : index
    %c0_0 = arith.constant 0 : index
    %0 = vector.load %arg2[%c0, %c0_0] : memref<16x32xf32, #tpu.memory_space<vmem>>, vector<16x32xf32>
    %c0_1 = arith.constant 0 : index
    %c0_2 = arith.constant 0 : index
    %1 = vector.load %arg4[%c0_1, %c0_2] : memref<32x32xf32, #tpu.memory_space<vmem>>, vector<32x32xf32>
    %cst = arith.constant dense<0.000000e+00> : vector<16x32xf32>
    %2 = tpu.matmul %0, %1, %cst {dimension_numbers = #tpu.dot_dimension_numbers<[1], [0], [0], [1], [0, 0, 1, 1], [], []>} : vector<16x32xf32>, vector<32x32xf32>, vector<16x32xf32> -> vector<16x32xf32>
    %c0_3 = arith.constant 0 : index
    %c0_4 = arith.constant 0 : index
    %3 = vector.load %arg3[%c0_3, %c0_4] : memref<16x32xf32, #tpu.memory_space<vmem>>, vector<16x32xf32>
    %4 = arith.mulf %2, %3 : vector<16x32xf32>
    %cst_5 = arith.constant dense<0.000000e+00> : vector<16xf32>
    %5 = vector.multi_reduction <add>, %4, %cst_5 [1] : vector<16x32xf32> to vector<16xf32>
    %c0_6 = arith.constant 0 : index
    %6 = memref.load %arg1[%c0_6] : memref<1xf32, #tpu.memory_space<smem>>
    %7 = vector.broadcast %6 : f32 to vector<16xf32>
    %8 = arith.addf %5, %7 : vector<16xf32>
    %9 = vector.shape_cast %8 : vector<16xf32> to vector<1x16xf32>
    %c0_7 = arith.constant 0 : index
    %c0_8 = arith.constant 0 : index
    %10 = vector.load %arg5[%c0_7, %c0_8] : memref<1x16xf32, #tpu.memory_space<vmem>>, vector<1x16xf32>
    tpu.vector_store %arg5[%c0_7, %c0_8], %9 {strides = array<i32>} : memref<1x16xf32, #tpu.memory_space<vmem>>, vector<1x16xf32>,
    return
  }
  func.func @transform_0(%arg0: i32, %arg1: memref<1xf32, #tpu.memory_space<smem>>) -> (i32, i32) {
    %c0_i32 = arith.constant 0 : i32
    %c0_i32_0 = arith.constant 0 : i32
    return %arg0, %c0_i32 : i32, i32
  }
  func.func @transform_1(%arg0: i32, %arg1: memref<1xf32, #tpu.memory_space<smem>>) -> (i32, i32) {
    %c0_i32 = arith.constant 0 : i32
    %c0_i32_0 = arith.constant 0 : i32
    return %arg0, %c0_i32 : i32, i32
  }
  func.func @transform_2(%arg0: i32, %arg1: memref<1xf32, #tpu.memory_space<smem>>) -> (i32, i32) {
    %c0_i32 = arith.constant 0 : i32
    %c0_i32_0 = arith.constant 0 : i32
    %c0_i32_1 = arith.constant 0 : i32
    return %c0_i32, %c0_i32_0 : i32, i32
  }
  func.func @transform_3(%arg0: i32, %arg1: memref<1xf32, #tpu.memory_space<smem>>) -> (i32, i32) {
    %c0_i32 = arith.constant 0 : i32
    %c0_i32_0 = arith.constant 0 : i32
    return %c0_i32, %arg0 : i32, i32
  }
}

</mosaic_0001>

<bundles_post_ra>
// kernel: tpu_custom_call.1
= control target key start
LH: loop header
LB: loop body
LE: loop exit
PB: predicated region body
PF: predicated region fallthrough
CT: control target
= control target key end

     0   :  { %10 = vsyncpa [#allocation5], 0  ;;  %s423_s0 = inlined_call_operand.<no memory space> [shape: f32[1], index: 0, kind: input, shape index: {}]   ;;  %s424_s1 = inlined_call_operand.hbm [shape: f32[16,32], index: 1, kind: input, shape index: {}]   ;;  %s425_s2 = inlined_call_operand.hbm [shape: f32[16,32], index: 2, kind: input, shape index: {}]   ;;  %s426_s3 = inlined_call_operand.hbm [shape: f32[32,32], index: 3, kind: input, shape index: {}]   ;;  %s427_s4 = inlined_call_operand.hbm [shape: f32[1,16], index: 4, kind: output, shape index: {}]  }
   0x1   :  { %11 = vsyncpa [#allocation8], 0 }
   0x2   :  { %12 = vsyncpa [#allocation6], 0  ;;  %s321_s15 = smov [#allocation7]   ;;  %s322_s17 = smov [#allocation4]  }
   0x3   :  { %s30_s16 = sshll.u32 %s321_s15, 4  ;;  %s18_s18 = sshll.u32 %s322_s17, 4  ;;  %s31_s16 = int_to_ptr.vmem [resolvable:$true] %s30_s16  ;;  %s352_s18 = int_to_ptr.vmem [resolvable:$true] %s18_s18 }
   0x4   :  { %s227_s21 = scalar_lea.hbm %s425_s2, 256 }
   0x5   :  { %p228_p0 = scmp.ne.s32.totalorder %s425_s2, %s227_s21  ;;  %p231_p1 = scmp.lt.u32.totalorder %s227_s21, %s425_s2 }
   0x7   :  { %p233_p2 = pnand %p231_p1, %p228_p0 }
   0x9   :  { %236 = shalt.err (!%p233_p2)
}
   0xa   :  { %s237_s26 = scalar_lea.vmem %s31_s16, 256  ;;  %p242_p4 = scmp.lt.s32.totalorder %s31_s16, %s31_s16 }
   0xb   :  { %p238_p3 = scmp.ne.s32.totalorder %s31_s16, %s237_s26  ;;  %p243_p5 = scmp.lt.s32.totalorder %s237_s26, %s237_s26 }
   0xd   :  { %p244_p6 = por %p243_p5, %p242_p4 }
   0xf   :  { %p245_p7 = pnand %p244_p6, %p238_p3 }
  0x11   :  { %248 = shalt.err (!%p245_p7)
}
  0x12   :  { %s323_s27 = smov 128   ;;  %s324_s28 = smov 8  }
  0x13   :  { %36 = dma.hbm_to_vmem [thread:$0]  %s425_s2, 256, %s31_s16, [#allocation8], %s323_s27, %s323_s27, %s324_s28  }
  0x14   :  { %s249_s7 = scalar_lea.hbm %s424_s1, 256 }
  0x15   :  { %p250_p8 = scmp.ne.s32.totalorder %s424_s1, %s249_s7  ;;  %p253_p9 = scmp.lt.u32.totalorder %s249_s7, %s424_s1 }
  0x17   :  { %p255_p10 = pnand %p253_p9, %p250_p8 }
  0x19   :  { %258 = shalt.err (!%p255_p10)
}
  0x1a   :  { %s259_s12 = scalar_lea.vmem %s352_s18, 256  ;;  %p264_p12 = scmp.lt.s32.totalorder %s352_s18, %s352_s18 }
  0x1b   :  { %p260_p11 = scmp.ne.s32.totalorder %s352_s18, %s259_s12  ;;  %p265_p13 = scmp.lt.s32.totalorder %s259_s12, %s259_s12 }
  0x1d   :  { %p266_p0 = por %p265_p13, %p264_p12 }
  0x1f   :  { %p267_p1 = pnand %p266_p0, %p260_p11 }
  0x21   :  { %270 = shalt.err (!%p267_p1)
}
  0x22   :  { %24 = dma.hbm_to_vmem [thread:$0]  %s424_s1, 256, %s352_s18, [#allocation5], %s323_s27, %s323_s27, %s324_s28  }
  0x23   :  { %s325_s14 = smov [#allocation9]   ;;  %s271_s19 = scalar_lea.hbm %s426_s3, 512 }
  0x24   :  { %s42_s15 = sshll.u32 %s325_s14, 4  ;;  %p272_p2 = scmp.ne.s32.totalorder %s426_s3, %s271_s19  ;;  %s43_s15 = int_to_ptr.vmem [resolvable:$true] %s42_s15 }
  0x25   :  { %p275_p3 = scmp.lt.u32.totalorder %s271_s19, %s426_s3 }
  0x27   :  { %p277_p4 = pnand %p275_p3, %p272_p2 }
  0x29   :  { %280 = shalt.err (!%p277_p4)
}
  0x2a   :  { %s281_s24 = scalar_lea.vmem %s43_s15, 512  ;;  %p286_p6 = scmp.lt.s32.totalorder %s43_s15, %s43_s15 }
  0x2b   :  { %p282_p5 = scmp.ne.s32.totalorder %s43_s15, %s281_s24  ;;  %p287_p7 = scmp.lt.s32.totalorder %s281_s24, %s281_s24 }
  0x2d   :  { %p288_p8 = por %p287_p7, %p286_p6 }
  0x2f   :  { %p289_p9 = pnand %p288_p8, %p282_p5 }
  0x31   :  { %292 = shalt.err (!%p289_p9)
}
  0x32   :  { %48 = dma.hbm_to_vmem [thread:$0]  %s426_s3, 512, %s43_s15, [#allocation8], %s323_s27, %s323_s27, %s324_s28  }
  0x33   :  { %315 = dma.done.wait [#allocation5], 256  }
  0x34   :  { %316 = vsyncadd [#allocation5], 4294967040 }
  0x35   :  { %317 = dma.done.wait [#allocation8], 768  }
  0x36   :  { %318 = vsyncadd [#allocation8], 4294966528  ;;  %vm64_vm0 = vcmask 261120   ;;  %v60_v0 = vld [vmem:[#allocation9] sm:$0xff]  ;;  %v61_v1 = vld [vmem:[#allocation9 + $0x8] sm:$0xff]  ;;  %v162_v16 = vlaneseq  ;;  %v157_v20 = vstv %s423_s0  ;;  %s326_s26 = smov [#allocation10]  }
  0x37   :  { %v62_v2 = vld [vmem:[#allocation9 + $0x10] sm:$0xff]  ;;  %v213_v3 = vpack.c.bf16 %v61_v1, %v60_v0  ;;  %v63_v4 = vld [vmem:[#allocation9 + $0x18] sm:$0xff]  ;;  %v58_v5 = vld [vmem:[#allocation4] sm:$0xff]  ;;  %s184_s27 = sshll.u32 %s326_s26, 4  ;;  %vm173_vm1 = vcmask 130112   ;;  %vm176_vm2 = vcmask 122880   ;;  %s185_s27 = int_to_ptr.vmem [resolvable:$true] %s184_s27 }
  0x38   :  { %v217_v6 = vpack.c.bf16 %v63_v4, %v62_v2  ;;  %210 = vmatprep.mubr.msk.f32.mxu0 %vm64_vm0, %v58_v5  ;;  %v59_v7 = vld [vmem:[#allocation4 + $0x8] sm:$0xff]  ;;  %v146_v8 = vld [vmem:[#allocation7] sm:$0xff]  ;;  %v147_v10 = vld [vmem:[#allocation7 + $0x8] sm:$0xff]  ;;  %v163_v17 = vand.u32 127, %v162_v16  ;;  %v165_v18 = vshrl.u32 %v162_v16, 7  ;;  %s293_s28 = scalar_lea.vmem %s185_s27, 16  ;;  %p298_p11 = scmp.lt.s32.totalorder %s185_s27, %s185_s27 }
  0x39   :  { %214 = vmatprep.subr.bf16.mxu0 %v213_v3  ;;  %p294_p10 = scmp.ne.s32.totalorder %s185_s27, %s293_s28  ;;  %s297_s29 = scalar_lea.vmem %s185_s27, 32 }
  0x3a   :  { %216 = vmatpush3.bf16.msra.mxu0 %v213_v3  ;;  %v168_v19 = vadd.s32 4294967288, %v163_v17  ;;  %v166_v22 = vsub.s32 %v163_v17, %v165_v18  ;;  %p299_p12 = scmp.lt.s32.totalorder %s297_s29, %s293_s28 }
  0x3b   :  { %218 = vmatprep.subr.bf16.mxu0 %v217_v6 }
  0x3c   :  { %v171_v24 = vsub.s32 %v168_v19, %v165_v18  ;;  %p300_p13 = por %p299_p12, %p298_p11 }
  0x3e   :  { %220 = vmatpush3.bf16.msra.mxu0 %v217_v6  ;;  %p301_p0 = pnand %p300_p13, %p294_p10 }
  0x41   :  { %211 = vmatmul.mubr.msk.f32.vlgmr.msra.gmra.mrb[0].mxu0 %vm64_vm0, %v59_v7 }
 0x114   :  { %v212_v9 = vpop.f32.mrb[0].mxu0 }
 0x115   :  { %v137_v11 = vpop.f32.mrb[1].mxu0  ;;  %v149_v13 = vmul.f32 %v212_v9, %v147_v10 }
 0x116   :  { %v148_v12 = vmul.f32 %v146_v8, %v137_v11 }
 0x117   :  { %v153_v15 = vsel %vm64_vm0, %v149_v13, 0.0 }
 0x118   :  { %v150_v14 = vsel %vm64_vm0, %v148_v12, 0.0 }
 0x119   :  { %151 = vadd.xlane.f32.xlu0 %v150_v14 }
 0x11d   :  { %154 = vadd.xlane.f32.xlu0 %v153_v15 }
 0x1a6   :  { %v152_v21 = vpop.xlane.xlu0 %151 }
 0x1a7   :  { %v158_v23 = vadd.f32 %v157_v20, %v152_v21 }
 0x1a9   :  { %v167_v27 = vrot.slane %v158_v23, %v166_v22 }
 0x1aa   :  { %v155_v25 = vpop.xlane.xlu0 %154 }
 0x1ab   :  { %v159_v26 = vadd.f32 %v157_v20, %v155_v25 }
 0x1ad   :  { %v172_v28 = vrot.slane %v159_v26, %v171_v24 }
 0x1af   :  { %v174_v29 = vsel %vm173_vm1, %v172_v28, %v167_v27 }
 0x1b0   :  { %177 = vst.msk [vmem:[#allocation10] sm:$0x1] %vm176_vm2, %v174_v29 }
 0x1b1   :  { %304 = shalt.err (!%p301_p0)
}
 0x1b2   :  { %s305_s5 = scalar_lea.hbm %s427_s4, 16 }
 0x1b3   :  { %p306_p1 = scmp.ne.s32.totalorder %s427_s4, %s305_s5  ;;  %p309_p2 = scmp.lt.u32.totalorder %s305_s5, %s427_s4 }
 0x1b5   :  { %p311_p3 = pnand %p309_p2, %p306_p1 }
 0x1b7   :  { %314 = shalt.err (!%p311_p3)
}
 0x1b8   :  { %187 = dma.vmem_to_hbm [thread:$0]  %s185_s27, 16, %s427_s4, [#allocation6]  }
 0x1b9   :  { %319 = dma.done.wait [#allocation6], 16  }
 0x1ba   :  { %320 = vsyncadd [#allocation6], 4294967280 }
 0x1bb   :  { %191 = vsyncpa [#allocation5], 1 }
 0x1bc   :  { %192 = vsyncpa [#allocation8], 1 }
 0x1bd   :  { %193 = vsyncpa [#allocation6], 1 }

</bundles_post_ra>
